<compile_context>
chip_gen: v5e
topology: v5e:2x2
jax: 0.10.0
libtpu: 0.0.40
codegen_flags: <defaults>
</compile_context>

<pallas_src>
import functools

import jax
import jax.numpy as jnp
from jax import lax
from jax.experimental import pallas as pl
from jax.experimental.pallas import tpu as pltpu


def _pair(v):
    if isinstance(v, (tuple, list)):
        assert len(v) == 2
        return int(v[0]), int(v[1])
    return int(v), int(v)


def _min_value(dtype):
    dtype = jnp.dtype(dtype)
    if jnp.issubdtype(dtype, jnp.floating):
        return jnp.array(-jnp.inf, dtype)
    return jnp.array(jnp.iinfo(dtype).min, dtype)


def _maxpool_kernel(x_ref, o_ref, *scratch, H, W, Hp, Wp, Ho, Wo,
                    kh, kw, sh, sw, dh, dw, ph, pw):
    """Separable VPU tap-max pooling.

    x_ref: [tile_n, H, W]    input planes (sublane = H, lane = W), original dtype
    o_ref: [tile_n, Ho, Wo]  pooled output
    scratch: optional padded-plane buffer [tile_n, Hp, Wp] (only when padding > 0)
             followed by the row-pooled transpose buffer [tile_n, Wp, Ho].
    """
    if ph or pw:
        p_ref, t_ref = scratch
        # In-kernel padding: -inf (floats) / INT_MIN (ints), never finfo-min-through-matmul.
        p_ref[...] = jnp.full(p_ref.shape, _min_value(p_ref.dtype), p_ref.dtype)
        p_ref[:, pl.ds(ph, H), pl.ds(pw, W)] = x_ref[...]
        src = p_ref
    else:
        (t_ref,) = scratch
        src = x_ref

    # ---- pool along H: kh sublane-strided taps, running max on the VPU ----------
    rmax = None
    for di in range(kh):                                   # kh is small & static
        tap = src[:, pl.ds(di * dh, Ho, stride=sh), :]     # [tile_n, Ho, Wp]
        rmax = tap if rmax is None else jnp.maximum(rmax, tap)

    # Put W on sublanes (XLU transpose) so width taps are also sublane-strided loads;
    # no lane-strided gathers and no MXU anywhere.
    t_ref[...] = jnp.swapaxes(rmax, 1, 2)                  # [tile_n, Wp, Ho]

    # ---- pool along W: kw sublane-strided taps on the transposed buffer ----------
    cmax_t = None
    for dj in range(kw):
        tap = t_ref[:, pl.ds(dj * dw, Wo, stride=sw), :]   # [tile_n, Wo, Ho]
        cmax_t = tap if cmax_t is None else jnp.maximum(cmax_t, tap)

    o_ref[...] = jnp.swapaxes(cmax_t, 1, 2).astype(o_ref.dtype)   # [tile_n, Ho, Wo]


def _pick_tile_n(n_planes, plane_bytes, budget_bytes=2 << 20):
    """Largest divisor of n_planes whose input block stays under ~2 MiB, with at
    least 2 grid steps (when possible) so the parallel axis can shard on v7x."""
    cap = max(1, budget_bytes // max(plane_bytes, 1))
    if n_planes >= 2:
        cap = min(cap, max(1, n_planes // 2))
    t = max(1, min(n_planes, cap))
    while n_planes % t:
        t -= 1
    return t


def bayesian_max_pool2d_forward(x, kl, kernel_size, stride=None, padding=0,
                                dilation=1, ceil_mode=False,
                                return_indices=False):
    """Mirrors BayesianMaxPool2d.forward(x, kl) -> (F.max_pool2d(x, ...), kl)."""
    if return_indices:
        # TODO(synk): return_indices=True needs an argmax/index kernel; not implemented.
        raise NotImplementedError("return_indices=True is not supported")
    if ceil_mode:
        # TODO(synk): ceil_mode output-size rule not implemented.
        raise NotImplementedError("ceil_mode=True is not supported")

    kh, kw = _pair(kernel_size)
    sh, sw = _pair(stride) if stride is not None else (kh, kw)
    ph, pw = _pair(padding)
    dh, dw = _pair(dilation)

    B, C, H, W = x.shape
    Hp, Wp = H + 2 * ph, W + 2 * pw
    Ho = (Hp - (dh * (kh - 1) + 1)) // sh + 1
    Wo = (Wp - (dw * (kw - 1) + 1)) // sw + 1
    assert Ho > 0 and Wo > 0, "pooling window does not fit the (padded) input"

    N = B * C
    x3 = x.reshape(N, H, W)                   # free reshape, no dtype cast, no pad copy
    tile_n = _pick_tile_n(N, Hp * Wp * x.dtype.itemsize)

    scratch_shapes = []
    if ph or pw:
        scratch_shapes.append(pltpu.VMEM((tile_n, Hp, Wp), x.dtype))
    scratch_shapes.append(pltpu.VMEM((tile_n, Wp, Ho), x.dtype))

    kernel = functools.partial(
        _maxpool_kernel, H=H, W=W, Hp=Hp, Wp=Wp, Ho=Ho, Wo=Wo,
        kh=kh, kw=kw, sh=sh, sw=sw, dh=dh, dw=dw, ph=ph, pw=pw)

    out3 = pl.pallas_call(
        kernel,
        out_shape=jax.ShapeDtypeStruct((N, Ho, Wo), x.dtype),
        grid=(N // tile_n,),
        in_specs=[pl.BlockSpec((tile_n, H, W), lambda n: (n, 0, 0))],
        out_specs=pl.BlockSpec((tile_n, Ho, Wo), lambda n: (n, 0, 0)),
        scratch_shapes=scratch_shapes,
        compiler_params=pltpu.CompilerParams(
            dimension_semantics=("parallel",)),   # shards across v7x's 2 TensorCores
    )(x3)

    out = out3.reshape(B, C, Ho, Wo)
    # BayesianMaxPool2d carries no variational parameters: kl passes through unchanged.
    return out, kl


if __name__ == "__main__":
    B, C, H, W = 2, 4, 16, 16
    kernel_size = 2                       # nn.MaxPool2d(2): stride defaults to kernel_size

    key = jax.random.PRNGKey(0)
    k_x, k_kl = jax.random.split(key)
    x = jax.random.normal(k_x, (B, C, H, W), dtype=jnp.float32)
    kl = jax.random.normal(k_kl, (), dtype=jnp.float32)   # running KL accumulator

    out, kl_out = bayesian_max_pool2d_forward(x, kl, kernel_size)
    jax.block_until_ready((out, kl_out))

    # Pure-JAX reference (F.max_pool2d with k=s=2, no padding, no dilation).
    ref = lax.reduce_window(
        x, -jnp.inf, lax.max,
        window_dimensions=(1, 1, kernel_size, kernel_size),
        window_strides=(1, 1, kernel_size, kernel_size),
        padding="VALID",
    )

    assert out.shape == (B, C, H // 2, W // 2)
    assert out.dtype == x.dtype
    assert bool(jnp.all(jnp.isfinite(out)))
    assert bool(jnp.array_equal(out, ref))          # max pool is exact in-dtype
    assert bool(jnp.allclose(kl_out, kl))

    print("KERNEL_OK")
</pallas_src>

<mosaic_0001>
module attributes {stable_mosaic.version = 11 : i64} {
  func.func @_maxpool_kernel(%arg0: i32, %arg1: memref<4x16x16xf32, #tpu.memory_space<vmem>>, %arg2: memref<4x8x8xf32, #tpu.memory_space<vmem>>, %arg3: memref<4x16x8xf32, #tpu.memory_space<vmem>>) attributes {dimension_semantics = [#tpu.dimension_semantics<parallel>], iteration_bounds = array<i64: 2>, scalar_prefetch = 0 : i64, scratch_operands = 1 : i64, tpu.core_type = #tpu.core_type<tc>, window_params = [{transform_indices = @transform_0, window_bounds = array<i64: 4, 16, 16>}, {transform_indices = @transform_1, window_bounds = array<i64: 4, 8, 8>}]} {
    %c0 = arith.constant 0 : index
    %c0_0 = arith.constant 0 : index
    %c0_1 = arith.constant 0 : index
    %0 = tpu.strided_load %arg1[%c0, %c0_0, %c0_1] {strides = array<i32: 1, 2, 1>} : memref<4x16x16xf32, #tpu.memory_space<vmem>>, vector<4x8x16xf32>
    %c0_2 = arith.constant 0 : index
    %c1 = arith.constant 1 : index
    %c0_3 = arith.constant 0 : index
    %1 = tpu.strided_load %arg1[%c0_2, %c1, %c0_3] {strides = array<i32: 1, 2, 1>} : memref<4x16x16xf32, #tpu.memory_space<vmem>>, vector<4x8x16xf32>
    %2 = arith.maximumf %0, %1 : vector<4x8x16xf32>
    %3 = tpu.transpose %2, [0, 2, 1] : vector<4x8x16xf32> -> vector<4x16x8xf32>
    %c0_4 = arith.constant 0 : index
    %c0_5 = arith.constant 0 : index
    %c0_6 = arith.constant 0 : index
    %4 = vector.load %arg3[%c0_4, %c0_5, %c0_6] : memref<4x16x8xf32, #tpu.memory_space<vmem>>, vector<4x16x8xf32>
    tpu.vector_store %arg3[%c0_4, %c0_5, %c0_6], %3 {strides = array<i32>} : memref<4x16x8xf32, #tpu.memory_space<vmem>>, vector<4x16x8xf32>,
    %c0_7 = arith.constant 0 : index
    %c0_8 = arith.constant 0 : index
    %c0_9 = arith.constant 0 : index
    %5 = tpu.strided_load %arg3[%c0_7, %c0_8, %c0_9] {strides = array<i32: 1, 2, 1>} : memref<4x16x8xf32, #tpu.memory_space<vmem>>, vector<4x8x8xf32>
    %c0_10 = arith.constant 0 : index
    %c1_11 = arith.constant 1 : index
    %c0_12 = arith.constant 0 : index
    %6 = tpu.strided_load %arg3[%c0_10, %c1_11, %c0_12] {strides = array<i32: 1, 2, 1>} : memref<4x16x8xf32, #tpu.memory_space<vmem>>, vector<4x8x8xf32>
    %7 = arith.maximumf %5, %6 : vector<4x8x8xf32>
    %8 = tpu.transpose %7, [0, 2, 1] : vector<4x8x8xf32> -> vector<4x8x8xf32>
    %c0_13 = arith.constant 0 : index
    %c0_14 = arith.constant 0 : index
    %c0_15 = arith.constant 0 : index
    %9 = vector.load %arg2[%c0_13, %c0_14, %c0_15] : memref<4x8x8xf32, #tpu.memory_space<vmem>>, vector<4x8x8xf32>
    tpu.vector_store %arg2[%c0_13, %c0_14, %c0_15], %8 {strides = array<i32>} : memref<4x8x8xf32, #tpu.memory_space<vmem>>, vector<4x8x8xf32>,
    return
  }
  func.func @transform_0(%arg0: i32) -> (i32, i32, i32) {
    %c0_i32 = arith.constant 0 : i32
    %c0_i32_0 = arith.constant 0 : i32
    %c0_i32_1 = arith.constant 0 : i32
    return %arg0, %c0_i32, %c0_i32_0 : i32, i32, i32
  }
  func.func @transform_1(%arg0: i32) -> (i32, i32, i32) {
    %c0_i32 = arith.constant 0 : i32
    %c0_i32_0 = arith.constant 0 : i32
    %c0_i32_1 = arith.constant 0 : i32
    return %arg0, %c0_i32, %c0_i32_0 : i32, i32, i32
  }
}

</mosaic_0001>

<bundles_post_ra>
// kernel: tpu_custom_call.1
= control target key start
LH: loop header
LB: loop body
LE: loop exit
PB: predicated region body
PF: predicated region fallthrough
CT: control target
= control target key end

     0   :  { %6 = vsyncpa [#allocation4], 0  ;;  %s864_s0 = inlined_call_operand.hbm [shape: f32[8,16,16], index: 0, kind: input, shape index: {}]   ;;  %s865_s1 = inlined_call_operand.hbm [shape: f32[8,8,8], index: 1, kind: output, shape index: {}]  }
   0x1   :  { %8 = vsyncpa [#allocation4 + $0x1], 0 }
   0x2   :  { %9 = vsyncpa [#allocation5], 0 }
   0x3   :  { %11 = vsyncpa [#allocation5 + $0x1], 0  ;;  %s724_s6 = smov 0   ;;  %s726_s7 = smov 0  }
   0x4   :  { %s728_s8 = smov 0   ;;  %s730_s9 = smov 0  }
   0x5 LB: > { %s745_s10 = sadd.s32 4294967295, %s708_s9   ;;  %s536_s11 = sadd.s32 4294967294, %s708_s9   ;;  %s708_s9 = sphi %s730_s9, %s875_s9   ;;  %s704_s8 = sphi %s728_s8, %s874_s8   ;;  %s700_s7 = sphi %s726_s7, %s873_s7   ;;  %s696_s6 = sphi %s724_s6, %s872_s6  }
   0x6   : > { %s749_s12 = sadd.s32 1, %s708_s9   ;;  %s24_s13 = sadd.s32 1, %s704_s8 }
   0x7   : > { %s21_s14 = ssub.s32 %s708_s9, %s749_s12  ;;  %p31_p0 = scmp.ne.s32.totalorder %s704_s8, %s700_s7 }
   0x8   : > { %p22_p1 = scmp.eq.s32.totalorder %s21_s14, 0  ;;  %p32_p2 = scmp.eq.s32.totalorder %s708_s9, 0 }
   0x9   : > { %p37_p3 = scmp.ne.s32.totalorder %s700_s7, %s696_s6  ;;  %p38_p4 = scmp.eq.s32.totalorder %s745_s10, 0 }
   0xa   : > { %s761_s15 = scalar_select %p22_p1, %s704_s8, %s24_s13  }
   0xb   : > { %p763_p5 = por %p32_p2, %p31_p0  ;;  %p767_p6 = por %p38_p4, %p37_p3 }
   0xc   : > { %p61_p7 = scmp.eq.s32.totalorder %s745_s10, 1  ;;  %p67_p8 = scmp.eq.s32.totalorder %s536_s11, 1 }
   0xd   : > { %p573_p10 = scmp.lt.s32.totalorder %s708_s9, 2  ;;  %s87_s20 = sand.u32 1, %s704_s8  }
   0xe   : > { %p774_p11 = por %p61_p7, %p31_p0  ;;  %p778_p12 = por %p67_p8, %p37_p3 }
   0xf   : > { %s559_s21 = sshll.u32 %s708_s9, 6  ;;  %s539_s22 = sshll.u32 %s87_s20, 6 }
  0x10   : > { %s97_s25 = scalar_lea.hbm %s864_s0, %s559_s21  ;;  %s91_s27 = scalar_lea.vmem [#allocation3], %s539_s22 }
  0x11   : > { %s98_s26 = sshll.u32 %s97_s25, 4  ;;  %s100_s28 = sshll.u32 %s91_s27, 4  ;;  %s99_s26 = int_to_ptr.hbm [resolvable:$true] %s98_s26  ;;  %s101_s28 = int_to_ptr.vmem [resolvable:$true] %s100_s28 }
  0x12   : > { %p789_p13 = pnand %p573_p10, %p763_p5  ;;  %p543_p0 = scmp.ge.s32.totalorder %s708_s9, 1 }
  0x13   : > { %p108_p1 = scmp.lt.s32.totalorder %s708_s9, 3  ;;  %s88_s30 = scalar_lea.sflag [#allocation4], %s87_s20 }
  0x14   : > { %s612_s2 = sshra.s32 %s99_s26, 4  ;;  %p616_p3 = pneg %p789_p13  ;;  %s613_s2 = int_to_ptr.hbm [resolvable:$true] %s612_s2 }
  0x15   : > { %s614_s3 = scalar_lea.hbm %s613_s2, 64  ;;  %s619_s11 = scalar_lea.hbm %s864_s0, 128 }
  0x16   : > { %p615_p2 = scmp.ne.s32.totalorder %s613_s2, %s614_s3  ;;  %p620_p5 = scmp.lt.s32.totalorder %s613_s2, %s864_s0 }
  0x17   : > { %p621_p8 = scmp.lt.s32.totalorder %s619_s11, %s614_s3 }
  0x18   : > { %p617_p4 = pnand %p616_p3, %p615_p2 }
  0x19   : > { %p622_p10 = por %p621_p8, %p620_p5 }
  0x1a   : > { %p618_p7 = pneg %p617_p4 }
  0x1c   : > { %p623_p9 = pnand %p622_p10, %p618_p7 }
  0x1e   : > { %626 = shalt.err (!%p623_p9)
}
  0x1f   : > { %s710_s16 = smov 128   ;;  %s711_s20 = smov 8  }
  0x20   : > { %568 = dma.hbm_to_vmem [thread:$0]  (!%p789_p13), %s99_s26, 1024, %s101_s28, %s88_s30, %s710_s16, %s710_s16, %s711_s20  }
  0x21   : > { %p109_p2 = pnand %p543_p0, %p108_p1 }
  0x22   : > { %s810_s21 = sand.u32 (!%p109_p2), 1, %s700_s7  }
  0x23   : > { %112 = sbr.rel (%p109_p2) target bundleno = 412 (0x19c), region = 24  ;;  %s544_s22 = sshll.u32 (!%p109_p2), %s810_s21, 6 }
  0x24   : > { %s115_s23 = scalar_lea.sflag (!%p109_p2), [#allocation4], %s810_s21  ;;  %s118_s24 = scalar_lea.vmem (!%p109_p2), [#allocation3], %s544_s22 }
  0x28   : > { %687 = dma.done.wait (%p767_p6), %s115_s23, 1024  }
  0x29   : > { %689 = vsyncadd (%p767_p6), %s115_s23, 4294966272  ;;  %v547_v0 = vld [vmem:[%s118_s24 + $0x20] ss:$2 sm:$0xff]  ;;  %v551_v1 = vld [vmem:[%s118_s24 + $0x21] ss:$2 sm:$0xff]  ;;  %vm287_vm0 = vcmask 64512  }
  0x2a   : > { %v140_v2 = vld [vmem:[%s118_s24] ss:$2 sm:$0xff]  ;;  %v157_v3 = vmax.f32 %v547_v0, %v551_v1  ;;  %v549_v4 = vld [vmem:[%s118_s24 + $0x1] ss:$2 sm:$0xff]  ;;  %v548_v6 = vld [vmem:[%s118_s24 + $0x30] ss:$2 sm:$0xff] }
  0x2b   : > { %v155_v5 = vmax.f32 %v140_v2, %v549_v4  ;;  %v552_v7 = vld [vmem:[%s118_s24 + $0x31] ss:$2 sm:$0xff]  ;;  %v546_v8 = vld [vmem:[%s118_s24 + $0x10] ss:$2 sm:$0xff]  ;;  %s545_s17 = sshll.u32 %s810_s21, 5  ;;  %s560_s26 = sshll.u32 %s745_s10, 5 }
  0x2c   : > { %223 = vxpose.xlu1.b32.start.end [1/1] (short) (narrow) %v157_v3, 16  ;;  %v550_v9 = vld [vmem:[%s118_s24 + $0x11] ss:$2 sm:$0xff]  ;;  %v158_v10 = vmax.f32 %v548_v6, %v552_v7  ;;  %s137_s25 = scalar_lea.vmem [#allocation6], %s545_s17  ;;  %s459_s29 = scalar_lea.hbm %s865_s1, %s560_s26 }
  0x2d   : > { %159 = vxpose.xlu0.b32.start.end [1/1] (short) (narrow) %v155_v5, 16  ;;  %v156_v11 = vmax.f32 %v546_v8, %v550_v9  ;;  %s460_s30 = sshll.u32 %s137_s25, 4  ;;  %s462_s2 = sshll.u32 %s459_s29, 4  ;;  %s461_s30 = int_to_ptr.vmem [resolvable:$true] %s460_s30  ;;  %s463_s2 = int_to_ptr.hbm [resolvable:$true] %s462_s2 }
  0x2e   : > { %s448_s3 = scalar_lea.sflag [#allocation5], %s810_s21  ;;  %s656_s10 = sshra.s32 %s463_s2, 4  ;;  %s657_s10 = int_to_ptr.hbm [resolvable:$true] %s656_s10 }
  0x2f   : > { %s658_s4 = scalar_lea.hbm %s657_s10, 32  ;;  %s662_s13 = scalar_lea.hbm %s865_s1, 64 }
  0x30   : > { %p659_p6 = scmp.ne.s32.totalorder %s657_s10, %s658_s4  ;;  %p663_p0 = scmp.lt.s32.totalorder %s657_s10, %s865_s1 }
  0x31   : > { %p664_p1 = scmp.lt.s32.totalorder %s662_s13, %s658_s4 }
  0x32   : > { %p660_p9 = pnand %p659_p6, %p774_p11 }
  0x33   : > { %p665_p3 = por %p664_p1, %p663_p0 }
  0x34   : > { %p661_p13 = pneg %p660_p9 }
  0x36   : > { %p666_p4 = pnand %p665_p3, %p661_p13 }
  0x3c   : > { %255 = vxpose.xlu1.b32.start.end [1/1] (short) (narrow) %v158_v10, 16 }
  0x3d   : > { %191 = vxpose.xlu0.b32.start.end [1/1] (short) (narrow) %v156_v11, 16 }
  0xd0   : > { %v239_v12 = vpop.trf.xlu1 }
  0xd1   : > { %292 = vst.msk [vmem:[#allocation2 + $0x20] sm:$0xff] %vm287_vm0, %v239_v12  ;;  %v175_v13 = vpop.trf.xlu0 }
  0xd2   : > { %288 = vst.msk [vmem:[#allocation2] sm:$0xff] %vm287_vm0, %v175_v13 }
  0xd8   : > { %v240_v14 = vpop.trf.xlu1 }
  0xd9   : > { %293 = vst.msk [vmem:[#allocation2 + $0x28] sm:$0xff] %vm287_vm0, %v240_v14  ;;  %v176_v15 = vpop.trf.xlu0 }
  0xda   : > { %289 = vst.msk [vmem:[#allocation2 + $0x8] sm:$0xff] %vm287_vm0, %v176_v15 }
  0xe0   : > { %v271_v16 = vpop.trf.xlu1  ;;  %v300_v29 = vld [vmem:[#allocation2 + $0x20] ss:$2 sm:$0xff]  ;;  %v308_v30 = vld [vmem:[#allocation2 + $0x21] ss:$2 sm:$0xff] }
  0xe1   : > { %294 = vst.msk [vmem:[#allocation2 + $0x30] sm:$0xff] %vm287_vm0, %v271_v16  ;;  %v207_v17 = vpop.trf.xlu0  ;;  %v296_v18 = vld [vmem:[#allocation2] ss:$2 sm:$0xff]  ;;  %v304_v19 = vld [vmem:[#allocation2 + $0x1] ss:$2 sm:$0xff]  ;;  %v313_v31 = vmax.f32 %v300_v29, %v308_v30 }
  0xe2   : > { %290 = vst.msk [vmem:[#allocation2 + $0x10] sm:$0xff] %vm287_vm0, %v207_v17  ;;  %v311_v20 = vmax.f32 %v296_v18, %v304_v19 }
  0xe4   : > { %315 = vxpose.xlu2.b32.start.end [1/1] (short) (narrow) %v311_v20, 8 }
  0xe8   : > { %v272_v21 = vpop.trf.xlu1 }
  0xe9   : > { %295 = vst.msk [vmem:[#allocation2 + $0x38] sm:$0xff] %vm287_vm0, %v272_v21  ;;  %v208_v22 = vpop.trf.xlu0 }
  0xea   : > { %291 = vst.msk [vmem:[#allocation2 + $0x18] sm:$0xff] %vm287_vm0, %v208_v22 }
  0xf0   : > { %v302_v23 = vld [vmem:[#allocation2 + $0x30] ss:$2 sm:$0xff]  ;;  %v310_v24 = vld [vmem:[#allocation2 + $0x31] ss:$2 sm:$0xff] }
  0xf1   : > { %v314_v25 = vmax.f32 %v302_v23, %v310_v24  ;;  %v298_v26 = vld [vmem:[#allocation2 + $0x10] ss:$2 sm:$0xff]  ;;  %v306_v27 = vld [vmem:[#allocation2 + $0x11] ss:$2 sm:$0xff] }
  0xf2   : > { %v312_v28 = vmax.f32 %v298_v26, %v306_v27 }
  0xf3   : > { %411 = vxpose.xlu0.b32.start.end [1/1] (short) (narrow) %v314_v25, 8 }
  0xf4   : > { %347 = vxpose.xlu2.b32.start.end [1/1] (short) (narrow) %v312_v28, 8 }
  0xfc   : > { %379 = vxpose.xlu2.b32.start.end [1/1] (short) (narrow) %v313_v31, 8 }
 0x17d   : > { %v331_v32 = vpop.trf.xlu2 }
 0x17e   : > { %443 = vst.msk [vmem:[%s137_s25] sm:$0xff] %vm287_vm0, %v331_v32 }
 0x18d   : > { %v363_v33 = vpop.trf.xlu2 }
 0x18e   : > { %444 = vst.msk [vmem:[%s137_s25 + $0x8] sm:$0xff] %vm287_vm0, %v363_v33 }
 0x195   : > { %v395_v34 = vpop.trf.xlu2 }
 0x196   : > { %445 = vst.msk [vmem:[%s137_s25 + $0x10] sm:$0xff] %vm287_vm0, %v395_v34 }
 0x197   : > { %v427_v35 = vpop.trf.xlu0 }
 0x198   : > { %446 = vst.msk [vmem:[%s137_s25 + $0x18] sm:$0xff] %vm287_vm0, %v427_v35 }
 0x199   : > { %669 = shalt.err (!%p666_p4)
}
 0x19a   : > { %s712_s20 = smov 128   ;;  %s713_s21 = smov 8  }
 0x19b   : > { %563 = dma.vmem_to_hbm [thread:$0]  (%p774_p11), %s461_s30, 512, %s463_s2, %s448_s3, %s712_s20, %s712_s20, %s713_s21  }
 0x19c PF: > { %s477_s22 = sand.u32 1, %s696_s6   ;;  %p871_p7 = scmp.ge.s32.totalorder %s708_s9, 2 }
 0x19d   : > { %s478_s23 = scalar_lea.sflag [#allocation5], %s477_s22 }
 0x19e   : > { %p570_p5 = pnand %p871_p7, %p778_p12 }
 0x1a0   : > { %p571_p8 = pneg %p570_p5 }
 0x1a2   : > { %691 = dma.done.wait (%p571_p8), %s478_s23, 512  }
 0x1a3   : > { %693 = vsyncadd (%p571_p8), %s478_s23, 4294966784  ;;  %p14_p10 = scmp.ge.s32.totalorder %s749_s12, 4   ;;  %s872_s6 = smov %s700_s7 }
 0x1a4   : > { %s873_s7 = smov %s704_s8  ;;  %s874_s8 = smov %s761_s15 }
 0x1a5   : > { %s875_s9 = smov %s749_s12  ;;  %16 = sbr.rel (!%p14_p10) target bundleno = 5 (0x5), region = 83 }
 0x1aa   :  { %484 = vsyncpa [#allocation4], 1 }
 0x1ab   :  { %486 = vsyncpa [#allocation4 + $0x1], 1 }
 0x1ac   :  { %487 = vsyncpa [#allocation5], 1 }
 0x1ad   :  { %489 = vsyncpa [#allocation5 + $0x1], 1 }

</bundles_post_ra>
